<compile_context>
chip_gen: v7x
topology: tpu7x:2x2x1
jax: 0.10.0
libtpu: 0.0.40
codegen_flags: <defaults>
</compile_context>

<pallas_src>
import jax
import jax.numpy as jnp
from jax.experimental import pallas as pl
from jax.experimental.pallas import tpu as pltpu


_ROW_TILE_MAX = 512                      # rows per block (x512 lanes f32 = 1 MiB)
_INPUT_VMEM_BUDGET = 24 * 1024 * 1024    # double-buffered input budget (bytes)
_VMEM_LIMIT_BYTES = 48 * 1024 * 1024     # scoped VMEM limit handed to Mosaic
_MIN_PALLAS_ELEMS = 1 << 20              # below this, plain JAX wins


def _detect_tensorcores():
    """Best-effort TensorCores per device (v7x: 2, v5e/v6e: 1).  Defaults to 1."""
    try:
        info = pltpu.get_tpu_info()
    except Exception:
        return 1
    for attr in ("num_cores", "num_tensorcores", "tensorcore_count", "core_count"):
        v = getattr(info, attr, None)
        if v is None:
            continue
        try:
            v = int(v)
        except Exception:
            continue
        if v >= 1:
            return min(v, 2)
    return 1


def _make_kernel(num_scales):
    """Kernel over one (row_tile, lane) gt tile + num_scales pred tiles."""

    def kernel(*refs):
        gt_ref = refs[0]
        pred_refs = refs[1:1 + num_scales]
        sums_ref = refs[1 + num_scales]     # (num_scales, 8, lane), resident VMEM
        cnt_ref = refs[2 + num_scales]      # (8, lane), resident VMEM

        r = pl.program_id(1)                # row-tile index within this core

        @pl.when(r == 0)
        def _():
            sums_ref[...] = jnp.zeros_like(sums_ref)
            cnt_ref[...] = jnp.zeros_like(cnt_ref)

        gt = gt_ref[...].astype(jnp.float32)
        mask = (gt < 192.0) & (gt >= 0.0)
        maskf = mask.astype(jnp.float32)    # hoisted once, reused for the count

        rt, ln = gt.shape
        g = rt // 8

        # (g, 8, ln) keeps the native vreg layout: the axis-0 sum is pure
        # vreg-wise VPU adds (no per-step cross-lane XLU reduce).
        cnt_ref[...] += maskf.reshape(g, 8, ln).sum(axis=0)

        for si, pref in enumerate(pred_refs):
            # Fold the mask into d once: huber(0) == 0, so masked-out elements
            # contribute nothing and the second per-scale where() disappears.
            d = jnp.where(mask, pref[...].astype(jnp.float32) - gt, 0.0)
            ad = jnp.abs(d)
            q = jnp.minimum(ad, 1.0)
            elem = q * (ad - 0.5 * q)       # == 0.5*d^2 if |d|<1 else |d|-0.5
            sums_ref[si] += elem.reshape(g, 8, ln).sum(axis=0)

    return kernel


def _jax_partial(preds, gt):
    """Plain-JAX masked SmoothL1 partial sums (small-input fast path / tail)."""
    gtf = gt.astype(jnp.float32)
    mask = (gtf < 192.0) & (gtf >= 0.0)
    cnt = jnp.sum(mask.astype(jnp.int32))
    sums = []
    for p in preds:
        d = jnp.where(mask, p.astype(jnp.float32) - gtf, 0.0)
        ad = jnp.abs(d)
        q = jnp.minimum(ad, 1.0)
        sums.append(jnp.sum(q * (ad - 0.5 * q)))
    return jnp.stack(sums), cnt


def _masked_smoothl1_multi(preds, gt, *, min_pallas_elems=_MIN_PALLAS_ELEMS):
    """Returns (sums, cnt): sums[i] = sum of smoothl1(preds[i], gt) over the
    mask (gt in [0,192)), cnt = number of masked elements (float32)."""
    num_scales = len(preds)
    for p in preds:
        assert gt.shape[-1] == p.shape[-1]          # original module's assert
        # PyTorch boolean masking `input_[mask]` also requires matching shapes,
        # so this is the same effective contract as the reference module.
        assert p.shape == gt.shape

    n = int(gt.size)

    # Lane-dense zero-copy layout: a contiguous reshape to (rows, lane) is a
    # bitcast.  Pick the widest lane width (mult. of 128) that divides n.
    lane = next((c for c in (512, 256, 128) if n % c == 0), None)

    if lane is None or n < min_pallas_elems:
        s, cnt = _jax_partial(preds, gt)
        return s, cnt.astype(jnp.float32)

    rows = n // lane
    # Cap the row tile so (S+1) inputs x 2 pipeline buffers fit the budget.
    row_cap = _INPUT_VMEM_BUDGET // (2 * (num_scales + 1) * lane * 4)
    row_tile = (min(_ROW_TILE_MAX, max(row_cap, 8), rows) // 8) * 8
    blocks_total = rows // row_tile if row_tile >= 8 else 0
    if blocks_total == 0:
        s, cnt = _jax_partial(preds, gt)
        return s, cnt.astype(jnp.float32)

    # TODO(synk): on v7x, switch this axis to pltpu.CORE_PARALLEL once the
    # 2-TensorCore sharding of a "parallel" axis is verified via xprof.
    core_split = max(1, min(_detect_tensorcores(), blocks_total))
    nrb = blocks_total // core_split
    kernel_rows = core_split * nrb * row_tile

    gt2d = gt.reshape(rows, lane)            # bitcast — no HBM copy
    preds2d = [p.reshape(rows, lane) for p in preds]

    row_spec = pl.BlockSpec((row_tile, lane), lambda c, r: (c * nrb + r, 0))

    sums_part, cnt_part = pl.pallas_call(
        _make_kernel(num_scales),
        out_shape=(
            jax.ShapeDtypeStruct((core_split, num_scales, 8, lane), jnp.float32),
            jax.ShapeDtypeStruct((core_split, 8, lane), jnp.float32),
        ),
        grid_spec=pltpu.PrefetchScalarGridSpec(
            num_scalar_prefetch=0,
            grid=(core_split, nrb),
            in_specs=[row_spec] * (num_scales + 1),
            out_specs=[
                pl.BlockSpec((None, num_scales, 8, lane),
                             lambda c, r: (c, 0, 0, 0)),
                pl.BlockSpec((None, 8, lane),
                             lambda c, r: (c, 0, 0)),
            ],
        ),
        compiler_params=pltpu.CompilerParams(
            dimension_semantics=("parallel", "arbitrary"),
            vmem_limit_bytes=_VMEM_LIMIT_BYTES),
    )(gt2d, *preds2d)

    # Tiny final cross-lane reduction in plain JAX.
    sums = jnp.sum(sums_part, axis=(0, 2, 3))                    # (S,)
    # Per-slot partials are exact small integers in f32; sum them in int32 so
    # the total count stays exact past 2^24 elements.
    cnt = jnp.sum(cnt_part.astype(jnp.int32))

    if kernel_rows < rows:
        # Ragged tail (< core_split*row_tile rows): one fused XLA reduce that
        # reads exactly the tail bytes — no padded copies of the full maps.
        t_sums, t_cnt = _jax_partial([p[kernel_rows:] for p in preds2d],
                                     gt2d[kernel_rows:])
        sums = sums + t_sums
        cnt = cnt + t_cnt

    return sums, cnt.astype(jnp.float32)


def multiple_equal_loss(disp_infer, disp_gt, weights=None, *,
                        min_pallas_elems=_MIN_PALLAS_ELEMS):
    """JAX/Pallas port of Multiple_Equal_Loss.forward (Smooth_l1 loss)."""
    if isinstance(disp_infer, (tuple, list)):
        preds = list(disp_infer)
        if weights is None:
            weights = [1.0] * len(preds)
        sums, cnt = _masked_smoothl1_multi(preds, disp_gt,
                                           min_pallas_elems=min_pallas_elems)
        w = jnp.asarray(weights, dtype=jnp.float32)
        # NOTE: empty mask -> division by zero (NaN/Inf), same as the PyTorch
        # reference behaviour of a mean over zero elements.
        return jnp.sum((sums / cnt) * w)
    sums, cnt = _masked_smoothl1_multi([disp_infer], disp_gt,
                                       min_pallas_elems=min_pallas_elems)
    return sums[0] / cnt


if __name__ == "__main__":
    key = jax.random.PRNGKey(0)
    k_gt1, k_gt2, k1, k2, k3, k4 = jax.random.split(key, 6)

    # Pure-JAX reference (same semantics as the PyTorch module).
    def ref_loss(preds, gt, w):
        gt = gt.astype(jnp.float32)
        mask = (gt < 192.0) & (gt >= 0.0)
        total = 0.0
        for i, p in enumerate(preds):
            d = p.astype(jnp.float32) - gt
            ad = jnp.abs(d)
            e = jnp.where(ad < 1.0, 0.5 * d * d, ad - 0.5)
            total = total + (jnp.sum(jnp.where(mask, e, 0.0))
                             / jnp.sum(mask)) * w[i]
        return total

    # ---- case 1: multi-scale list, size divisible by 512 (pure kernel path) --
    B, H, W = 2, 32, 64
    disp_gt = jax.random.uniform(k_gt1, (B, H, W), jnp.float32,
                                 minval=-20.0, maxval=220.0)
    disp_infer = [
        disp_gt + jax.random.normal(k1, (B, H, W), jnp.float32) * 0.5,
        disp_gt + jax.random.normal(k2, (B, H, W), jnp.float32) * 2.0,
        disp_gt + jax.random.normal(k3, (B, H, W), jnp.float32) * 5.0,
    ]
    weights = [0.5, 0.7, 1.0]
    loss1 = multiple_equal_loss(disp_infer, disp_gt, weights,
                                min_pallas_elems=0)      # force Pallas path
    loss1 = jax.block_until_ready(loss1)
    ref1 = ref_loss(disp_infer, disp_gt, weights)
    assert jnp.allclose(loss1, ref1, rtol=1e-4, atol=1e-4), (loss1, ref1)

    # ---- case 2: single bf16 prediction, ragged size (kernel prefix + JAX tail)
    B, H, W = 2, 48, 40            # n = 3840 -> lane = 256, 8-row block + tail
    gt2 = jax.random.uniform(k_gt2, (B, H, W), jnp.float32,
                             minval=-20.0, maxval=220.0)
    pred2 = (gt2 + jax.random.normal(k4, (B, H, W), jnp.float32) * 2.0
             ).astype(jnp.bfloat16)
    loss2 = multiple_equal_loss(pred2, gt2, min_pallas_elems=0)
    loss2 = jax.block_until_ready(loss2)
    ref2 = ref_loss([pred2], gt2, [1.0])
    assert jnp.allclose(loss2, ref2, rtol=1e-3, atol=1e-3), (loss2, ref2)

    print("KERNEL_OK")
</pallas_src>

<mosaic_0001>
module attributes {stable_mosaic.version = 11 : i64} {
  func.func @kernel(%arg0: i32, %arg1: i32, %arg2: memref<8x512xf32, #tpu.memory_space<vmem>>, %arg3: memref<8x512xf32, #tpu.memory_space<vmem>>, %arg4: memref<8x512xf32, #tpu.memory_space<vmem>>, %arg5: memref<8x512xf32, #tpu.memory_space<vmem>>, %arg6: memref<1x3x8x512xf32, #tpu.memory_space<vmem>>, %arg7: memref<1x8x512xf32, #tpu.memory_space<vmem>>) attributes {dimension_semantics = [#tpu.dimension_semantics<parallel>, #tpu.dimension_semantics<arbitrary>], iteration_bounds = array<i64: 1, 1>, scalar_prefetch = 0 : i64, scratch_operands = 0 : i64, tpu.core_type = #tpu.core_type<tc>, window_params = [{transform_indices = @transform_0, window_bounds = array<i64: 8, 512>}, {transform_indices = @transform_1, window_bounds = array<i64: 8, 512>}, {transform_indices = @transform_2, window_bounds = array<i64: 8, 512>}, {transform_indices = @transform_3, window_bounds = array<i64: 8, 512>}, {transform_indices = @transform_4, window_bounds = array<i64: 1, 3, 8, 512>}, {transform_indices = @transform_5, window_bounds = array<i64: 1, 8, 512>}]} {
    %c0_i32 = arith.constant 0 : i32
    %0 = arith.cmpi eq, %arg1, %c0_i32 : i32
    %1 = arith.extui %0 : i1 to i32
    %c0_i32_0 = arith.constant 0 : i32
    %2 = arith.cmpi ne, %1, %c0_i32_0 : i32
    scf.if %2 {
      %cst_50 = arith.constant 0.000000e+00 : f32
      %76 = vector.broadcast %cst_50 : f32 to vector<3x8x512xf32>
      %c0_51 = arith.constant 0 : index
      %c0_52 = arith.constant 0 : index
      %c0_53 = arith.constant 0 : index
      %c0_54 = arith.constant 0 : index
      %77 = vector.load %arg6[%c0_51, %c0_52, %c0_53, %c0_54] : memref<1x3x8x512xf32, #tpu.memory_space<vmem>>, vector<1x3x8x512xf32>
      %78 = vector.shape_cast %77 : vector<1x3x8x512xf32> to vector<3x8x512xf32>
      %79 = vector.shape_cast %76 : vector<3x8x512xf32> to vector<1x3x8x512xf32>
      tpu.vector_store %arg6[%c0_51, %c0_52, %c0_53, %c0_54], %79 {strides = array<i32>} : memref<1x3x8x512xf32, #tpu.memory_space<vmem>>, vector<1x3x8x512xf32>,
      %cst_55 = arith.constant 0.000000e+00 : f32
      %80 = vector.broadcast %cst_55 : f32 to vector<8x512xf32>
      %c0_56 = arith.constant 0 : index
      %c0_57 = arith.constant 0 : index
      %c0_58 = arith.constant 0 : index
      %81 = vector.load %arg7[%c0_56, %c0_57, %c0_58] : memref<1x8x512xf32, #tpu.memory_space<vmem>>, vector<1x8x512xf32>
      %82 = vector.shape_cast %81 : vector<1x8x512xf32> to vector<8x512xf32>
      %83 = vector.shape_cast %80 : vector<8x512xf32> to vector<1x8x512xf32>
      tpu.vector_store %arg7[%c0_56, %c0_57, %c0_58], %83 {strides = array<i32>} : memref<1x8x512xf32, #tpu.memory_space<vmem>>, vector<1x8x512xf32>,
    } else {
    }
    %c0 = arith.constant 0 : index
    %c0_1 = arith.constant 0 : index
    %3 = vector.load %arg2[%c0, %c0_1] : memref<8x512xf32, #tpu.memory_space<vmem>>, vector<8x512xf32>
    %cst = arith.constant 1.920000e+02 : f32
    %4 = vector.broadcast %cst : f32 to vector<8x512xf32>
    %5 = arith.cmpf olt, %3, %4 : vector<8x512xf32>
    %cst_2 = arith.constant 0.000000e+00 : f32
    %6 = vector.broadcast %cst_2 : f32 to vector<8x512xf32>
    %7 = arith.cmpf oge, %3, %6 : vector<8x512xf32>
    %8 = arith.andi %5, %7 : vector<8x512xi1>
    %9 = arith.extui %8 : vector<8x512xi1> to vector<8x512xi32>
    %10 = arith.sitofp %9 : vector<8x512xi32> to vector<8x512xf32>
    %c0_3 = arith.constant 0 : index
    %c0_4 = arith.constant 0 : index
    %c0_5 = arith.constant 0 : index
    %11 = vector.load %arg7[%c0_3, %c0_4, %c0_5] : memref<1x8x512xf32, #tpu.memory_space<vmem>>, vector<1x8x512xf32>
    %12 = vector.shape_cast %11 : vector<1x8x512xf32> to vector<8x512xf32>
    %13 = vector.shape_cast %10 : vector<8x512xf32> to vector<1x8x512xf32>
    %cst_6 = arith.constant dense<0.000000e+00> : vector<8x512xf32>
    %14 = vector.multi_reduction <add>, %13, %cst_6 [0] : vector<1x8x512xf32> to vector<8x512xf32>
    %15 = arith.addf %12, %14 : vector<8x512xf32>
    %c0_7 = arith.constant 0 : index
    %c0_8 = arith.constant 0 : index
    %c0_9 = arith.constant 0 : index
    %16 = vector.load %arg7[%c0_7, %c0_8, %c0_9] : memref<1x8x512xf32, #tpu.memory_space<vmem>>, vector<1x8x512xf32>
    %17 = vector.shape_cast %16 : vector<1x8x512xf32> to vector<8x512xf32>
    %18 = vector.shape_cast %15 : vector<8x512xf32> to vector<1x8x512xf32>
    tpu.vector_store %arg7[%c0_7, %c0_8, %c0_9], %18 {strides = array<i32>} : memref<1x8x512xf32, #tpu.memory_space<vmem>>, vector<1x8x512xf32>,
    %c0_10 = arith.constant 0 : index
    %c0_11 = arith.constant 0 : index
    %19 = vector.load %arg3[%c0_10, %c0_11] : memref<8x512xf32, #tpu.memory_space<vmem>>, vector<8x512xf32>
    %20 = arith.subf %19, %3 : vector<8x512xf32>
    %cst_12 = arith.constant 0.000000e+00 : f32
    %21 = vector.broadcast %cst_12 : f32 to vector<8x512xf32>
    %22 = arith.select %8, %20, %21 : vector<8x512xi1>, vector<8x512xf32>
    %23 = math.absf %22 : vector<8x512xf32>
    %cst_13 = arith.constant 1.000000e+00 : f32
    %24 = vector.broadcast %cst_13 : f32 to vector<8x512xf32>
    %25 = arith.minimumf %23, %24 : vector<8x512xf32>
    %cst_14 = arith.constant 5.000000e-01 : f32
    %26 = vector.broadcast %cst_14 : f32 to vector<8x512xf32>
    %27 = arith.mulf %26, %25 : vector<8x512xf32>
    %28 = arith.subf %23, %27 : vector<8x512xf32>
    %29 = arith.mulf %25, %28 : vector<8x512xf32>
    %c0_15 = arith.constant 0 : index
    %c0_16 = arith.constant 0 : index
    %c0_17 = arith.constant 0 : index
    %c0_18 = arith.constant 0 : index
    %30 = vector.load %arg6[%c0_15, %c0_16, %c0_17, %c0_18] : memref<1x3x8x512xf32, #tpu.memory_space<vmem>>, vector<1x1x8x512xf32>
    %31 = vector.shape_cast %30 : vector<1x1x8x512xf32> to vector<8x512xf32>
    %32 = vector.shape_cast %29 : vector<8x512xf32> to vector<1x8x512xf32>
    %cst_19 = arith.constant dense<0.000000e+00> : vector<8x512xf32>
    %33 = vector.multi_reduction <add>, %32, %cst_19 [0] : vector<1x8x512xf32> to vector<8x512xf32>
    %34 = arith.addf %31, %33 : vector<8x512xf32>
    %c0_20 = arith.constant 0 : index
    %c0_21 = arith.constant 0 : index
    %c0_22 = arith.constant 0 : index
    %c0_23 = arith.constant 0 : index
    %35 = vector.load %arg6[%c0_20, %c0_21, %c0_22, %c0_23] : memref<1x3x8x512xf32, #tpu.memory_space<vmem>>, vector<1x1x8x512xf32>
    %36 = vector.shape_cast %35 : vector<1x1x8x512xf32> to vector<8x512xf32>
    %37 = vector.shape_cast %34 : vector<8x512xf32> to vector<1x1x8x512xf32>
    tpu.vector_store %arg6[%c0_20, %c0_21, %c0_22, %c0_23], %37 {strides = array<i32>} : memref<1x3x8x512xf32, #tpu.memory_space<vmem>>, vector<1x1x8x512xf32>,
    %c0_24 = arith.constant 0 : index
    %c0_25 = arith.constant 0 : index
    %38 = vector.load %arg4[%c0_24, %c0_25] : memref<8x512xf32, #tpu.memory_space<vmem>>, vector<8x512xf32>
    %39 = arith.subf %38, %3 : vector<8x512xf32>
    %cst_26 = arith.constant 0.000000e+00 : f32
    %40 = vector.broadcast %cst_26 : f32 to vector<8x512xf32>
    %41 = arith.select %8, %39, %40 : vector<8x512xi1>, vector<8x512xf32>
    %42 = math.absf %41 : vector<8x512xf32>
    %cst_27 = arith.constant 1.000000e+00 : f32
    %43 = vector.broadcast %cst_27 : f32 to vector<8x512xf32>
    %44 = arith.minimumf %42, %43 : vector<8x512xf32>
    %cst_28 = arith.constant 5.000000e-01 : f32
    %45 = vector.broadcast %cst_28 : f32 to vector<8x512xf32>
    %46 = arith.mulf %45, %44 : vector<8x512xf32>
    %47 = arith.subf %42, %46 : vector<8x512xf32>
    %48 = arith.mulf %44, %47 : vector<8x512xf32>
    %c0_29 = arith.constant 0 : index
    %c1 = arith.constant 1 : index
    %c0_30 = arith.constant 0 : index
    %c0_31 = arith.constant 0 : index
    %49 = vector.load %arg6[%c0_29, %c1, %c0_30, %c0_31] : memref<1x3x8x512xf32, #tpu.memory_space<vmem>>, vector<1x1x8x512xf32>
    %50 = vector.shape_cast %49 : vector<1x1x8x512xf32> to vector<8x512xf32>
    %51 = vector.shape_cast %48 : vector<8x512xf32> to vector<1x8x512xf32>
    %cst_32 = arith.constant dense<0.000000e+00> : vector<8x512xf32>
    %52 = vector.multi_reduction <add>, %51, %cst_32 [0] : vector<1x8x512xf32> to vector<8x512xf32>
    %53 = arith.addf %50, %52 : vector<8x512xf32>
    %c0_33 = arith.constant 0 : index
    %c1_34 = arith.constant 1 : index
    %c0_35 = arith.constant 0 : index
    %c0_36 = arith.constant 0 : index
    %54 = vector.load %arg6[%c0_33, %c1_34, %c0_35, %c0_36] : memref<1x3x8x512xf32, #tpu.memory_space<vmem>>, vector<1x1x8x512xf32>
    %55 = vector.shape_cast %54 : vector<1x1x8x512xf32> to vector<8x512xf32>
    %56 = vector.shape_cast %53 : vector<8x512xf32> to vector<1x1x8x512xf32>
    tpu.vector_store %arg6[%c0_33, %c1_34, %c0_35, %c0_36], %56 {strides = array<i32>} : memref<1x3x8x512xf32, #tpu.memory_space<vmem>>, vector<1x1x8x512xf32>,
    %c0_37 = arith.constant 0 : index
    %c0_38 = arith.constant 0 : index
    %57 = vector.load %arg5[%c0_37, %c0_38] : memref<8x512xf32, #tpu.memory_space<vmem>>, vector<8x512xf32>
    %58 = arith.subf %57, %3 : vector<8x512xf32>
    %cst_39 = arith.constant 0.000000e+00 : f32
    %59 = vector.broadcast %cst_39 : f32 to vector<8x512xf32>
    %60 = arith.select %8, %58, %59 : vector<8x512xi1>, vector<8x512xf32>
    %61 = math.absf %60 : vector<8x512xf32>
    %cst_40 = arith.constant 1.000000e+00 : f32
    %62 = vector.broadcast %cst_40 : f32 to vector<8x512xf32>
    %63 = arith.minimumf %61, %62 : vector<8x512xf32>
    %cst_41 = arith.constant 5.000000e-01 : f32
    %64 = vector.broadcast %cst_41 : f32 to vector<8x512xf32>
    %65 = arith.mulf %64, %63 : vector<8x512xf32>
    %66 = arith.subf %61, %65 : vector<8x512xf32>
    %67 = arith.mulf %63, %66 : vector<8x512xf32>
    %c0_42 = arith.constant 0 : index
    %c2 = arith.constant 2 : index
    %c0_43 = arith.constant 0 : index
    %c0_44 = arith.constant 0 : index
    %68 = vector.load %arg6[%c0_42, %c2, %c0_43, %c0_44] : memref<1x3x8x512xf32, #tpu.memory_space<vmem>>, vector<1x1x8x512xf32>
    %69 = vector.shape_cast %68 : vector<1x1x8x512xf32> to vector<8x512xf32>
    %70 = vector.shape_cast %67 : vector<8x512xf32> to vector<1x8x512xf32>
    %cst_45 = arith.constant dense<0.000000e+00> : vector<8x512xf32>
    %71 = vector.multi_reduction <add>, %70, %cst_45 [0] : vector<1x8x512xf32> to vector<8x512xf32>
    %72 = arith.addf %69, %71 : vector<8x512xf32>
    %c0_46 = arith.constant 0 : index
    %c2_47 = arith.constant 2 : index
    %c0_48 = arith.constant 0 : index
    %c0_49 = arith.constant 0 : index
    %73 = vector.load %arg6[%c0_46, %c2_47, %c0_48, %c0_49] : memref<1x3x8x512xf32, #tpu.memory_space<vmem>>, vector<1x1x8x512xf32>
    %74 = vector.shape_cast %73 : vector<1x1x8x512xf32> to vector<8x512xf32>
    %75 = vector.shape_cast %72 : vector<8x512xf32> to vector<1x1x8x512xf32>
    tpu.vector_store %arg6[%c0_46, %c2_47, %c0_48, %c0_49], %75 {strides = array<i32>} : memref<1x3x8x512xf32, #tpu.memory_space<vmem>>, vector<1x1x8x512xf32>,
    return
  }
  func.func @transform_0(%arg0: i32, %arg1: i32) -> (i32, i32) {
    %c1_i32 = arith.constant 1 : i32
    %0 = arith.muli %arg0, %c1_i32 : i32
    %1 = arith.addi %0, %arg1 : i32
    %c0_i32 = arith.constant 0 : i32
    %c0_i32_0 = arith.constant 0 : i32
    return %1, %c0_i32 : i32, i32
  }
  func.func @transform_1(%arg0: i32, %arg1: i32) -> (i32, i32) {
    %c1_i32 = arith.constant 1 : i32
    %0 = arith.muli %arg0, %c1_i32 : i32
    %1 = arith.addi %0, %arg1 : i32
    %c0_i32 = arith.constant 0 : i32
    %c0_i32_0 = arith.constant 0 : i32
    return %1, %c0_i32 : i32, i32
  }
  func.func @transform_2(%arg0: i32, %arg1: i32) -> (i32, i32) {
    %c1_i32 = arith.constant 1 : i32
    %0 = arith.muli %arg0, %c1_i32 : i32
    %1 = arith.addi %0, %arg1 : i32
    %c0_i32 = arith.constant 0 : i32
    %c0_i32_0 = arith.constant 0 : i32
    return %1, %c0_i32 : i32, i32
  }
  func.func @transform_3(%arg0: i32, %arg1: i32) -> (i32, i32) {
    %c1_i32 = arith.constant 1 : i32
    %0 = arith.muli %arg0, %c1_i32 : i32
    %1 = arith.addi %0, %arg1 : i32
    %c0_i32 = arith.constant 0 : i32
    %c0_i32_0 = arith.constant 0 : i32
    return %1, %c0_i32 : i32, i32
  }
  func.func @transform_4(%arg0: i32, %arg1: i32) -> (i32, i32, i32, i32) {
    %c0_i32 = arith.constant 0 : i32
    %c0_i32_0 = arith.constant 0 : i32
    %c0_i32_1 = arith.constant 0 : i32
    %c0_i32_2 = arith.constant 0 : i32
    return %arg0, %c0_i32, %c0_i32_0, %c0_i32_1 : i32, i32, i32, i32
  }
  func.func @transform_5(%arg0: i32, %arg1: i32) -> (i32, i32, i32) {
    %c0_i32 = arith.constant 0 : i32
    %c0_i32_0 = arith.constant 0 : i32
    %c0_i32_1 = arith.constant 0 : i32
    return %arg0, %c0_i32, %c0_i32_0 : i32, i32, i32
  }
}

</mosaic_0001>

<bundles_post_ra>
// kernel: tpu_custom_call.1
= control target key start
LH: loop header
LB: loop body
LE: loop exit
PB: predicated region body
PF: predicated region fallthrough
CT: control target
= control target key end

     0   :  { %11 = vsyncpa [#allocation3], 0  ;;  %s675_s0 = inlined_call_operand.hbm [shape: f32[8,512], index: 0, kind: input, shape index: {}]   ;;  %s676_s1 = inlined_call_operand.hbm [shape: f32[8,512], index: 1, kind: input, shape index: {}]   ;;  %s677_s2 = inlined_call_operand.hbm [shape: f32[8,512], index: 2, kind: input, shape index: {}]   ;;  %s678_s3 = inlined_call_operand.hbm [shape: f32[8,512], index: 3, kind: input, shape index: {}]   ;;  %s679_s4 = inlined_call_operand.hbm [shape: f32[1,3,8,512], index: 4, kind: output, shape index: {0}]   ;;  %s680_s5 = inlined_call_operand.hbm [shape: f32[1,8,512], index: 5, kind: output, shape index: {1}]  }
   0x1   :  { %12 = vsyncpa [#allocation6], 0 }
   0x2   :  { %13 = vsyncpa [#allocation9], 0 }
   0x3   :  { %14 = vsyncpa [#allocation4], 0 }
   0x4   :  { %15 = vsyncpa [#allocation12], 0  ;;  %s482_s18 = smov [#allocation5]   ;;  %s483_s20 = smov [#allocation2]  }
   0x5   :  { %s40_s19 = sshll.u32 %s482_s18, 4  ;;  %s26_s21 = sshll.u32 %s483_s20, 4  ;;  %s41_s19 = int_to_ptr.vmem [resolvable:$true] %s40_s19  ;;  %s27_s21 = int_to_ptr.vmem [resolvable:$true] %s26_s21 }
   0x6   :  { %s340_s24 = scalar_lea.hbm %s676_s1, 512 }
   0x7   :  { %p341_p0 = scmp.ne.s32.totalorder %s676_s1, %s340_s24  ;;  %p344_p1 = scmp.lt.u32.totalorder %s340_s24, %s676_s1 }
   0x9   :  { %p346_p2 = pnand %p344_p1, %p341_p0 }
   0xb   :  { %349 = shalt.err (!%p346_p2)
}
   0xc   :  { %s350_s29 = scalar_lea.vmem %s41_s19, 512  ;;  %p355_p4 = scmp.lt.s32.totalorder %s41_s19, %s41_s19 }
   0xd   :  { %p351_p3 = scmp.ne.s32.totalorder %s41_s19, %s350_s29  ;;  %p356_p5 = scmp.lt.s32.totalorder %s350_s29, %s350_s29 }
   0xf   :  { %p357_p6 = por %p356_p5, %p355_p4 }
  0x11   :  { %p358_p7 = pnand %p357_p6, %p351_p3 }
  0x13   :  { %361 = shalt.err (!%p358_p7)
}
  0x14   :  { %43 = dma.hbm_to_vmem [thread:$0]  %s676_s1, 512, %s41_s19, [#allocation6]  }
  0x15   :  { %s362_s9 = scalar_lea.hbm %s675_s0, 512 }
  0x16   :  { %p363_p8 = scmp.ne.s32.totalorder %s675_s0, %s362_s9  ;;  %p366_p9 = scmp.lt.u32.totalorder %s362_s9, %s675_s0 }
  0x18   :  { %p368_p10 = pnand %p366_p9, %p363_p8 }
  0x1a   :  { %371 = shalt.err (!%p368_p10)
}
  0x1b   :  { %s372_s14 = scalar_lea.vmem %s27_s21, 512  ;;  %p377_p12 = scmp.lt.s32.totalorder %s27_s21, %s27_s21 }
  0x1c   :  { %p373_p11 = scmp.ne.s32.totalorder %s27_s21, %s372_s14  ;;  %p378_p13 = scmp.lt.s32.totalorder %s372_s14, %s372_s14 }
  0x1e   :  { %p379_p0 = por %p378_p13, %p377_p12 }
  0x20   :  { %p380_p1 = pnand %p379_p0, %p373_p11 }
  0x22   :  { %383 = shalt.err (!%p380_p1)
}
  0x23   :  { %29 = dma.hbm_to_vmem [thread:$0]  %s675_s0, 512, %s27_s21, [#allocation3]  }
  0x24   :  { %s484_s16 = smov [#allocation7]   ;;  %s485_s18 = smov [#allocation8]  }
  0x25   :  { %s54_s17 = sshll.u32 %s484_s16, 4  ;;  %s68_s19 = sshll.u32 %s485_s18, 4  ;;  %s55_s17 = int_to_ptr.vmem [resolvable:$true] %s54_s17  ;;  %s69_s19 = int_to_ptr.vmem [resolvable:$true] %s68_s19 }
  0x26   :  { %s384_s23 = scalar_lea.hbm %s677_s2, 512 }
  0x27   :  { %p385_p2 = scmp.ne.s32.totalorder %s677_s2, %s384_s23  ;;  %p388_p3 = scmp.lt.u32.totalorder %s384_s23, %s677_s2 }
  0x29   :  { %p390_p4 = pnand %p388_p3, %p385_p2 }
  0x2b   :  { %393 = shalt.err (!%p390_p4)
}
  0x2c   :  { %s394_s0 = scalar_lea.vmem %s55_s17, 512  ;;  %p399_p6 = scmp.lt.s32.totalorder %s55_s17, %s55_s17 }
  0x2d   :  { %p395_p5 = scmp.ne.s32.totalorder %s55_s17, %s394_s0  ;;  %p400_p7 = scmp.lt.s32.totalorder %s394_s0, %s394_s0 }
  0x2f   :  { %p401_p8 = por %p400_p7, %p399_p6 }
  0x31   :  { %p402_p9 = pnand %p401_p8, %p395_p5 }
  0x33   :  { %405 = shalt.err (!%p402_p9)
}
  0x34   :  { %57 = dma.hbm_to_vmem [thread:$0]  %s677_s2, 512, %s55_s17, [#allocation6]  }
  0x35   :  { %s406_s6 = scalar_lea.hbm %s678_s3, 512 }
  0x36   :  { %p407_p10 = scmp.ne.s32.totalorder %s678_s3, %s406_s6  ;;  %p410_p11 = scmp.lt.u32.totalorder %s406_s6, %s678_s3 }
  0x38   :  { %p412_p12 = pnand %p410_p11, %p407_p10 }
  0x3a   :  { %415 = shalt.err (!%p412_p12)
}
  0x3b   :  { %s416_s11 = scalar_lea.vmem %s69_s19, 512  ;;  %p421_p0 = scmp.lt.s32.totalorder %s69_s19, %s69_s19 }
  0x3c   :  { %p417_p13 = scmp.ne.s32.totalorder %s69_s19, %s416_s11  ;;  %p422_p1 = scmp.lt.s32.totalorder %s416_s11, %s416_s11 }
  0x3e   :  { %p423_p2 = por %p422_p1, %p421_p0 }
  0x40   :  { %p424_p3 = pnand %p423_p2, %p417_p13 }
  0x42   :  { %427 = shalt.err (!%p424_p3)
}
  0x43   :  { %71 = dma.hbm_to_vmem [thread:$0]  %s678_s3, 512, %s69_s19, [#allocation9]  }
  0x44   :  { %472 = dma.done.wait [#allocation3], 512  }
  0x45   :  { %473 = vsyncadd [#allocation3], 4294966784 }
  0x46   :  { %474 = dma.done.wait [#allocation6], 1024  }
  0x47   :  { %475 = vsyncadd [#allocation6], 4294966272 }
  0x48   :  { %476 = dma.done.wait [#allocation9], 512  }
  0x49   :  { %477 = vsyncadd [#allocation9], 4294966784  ;;  %v569_v0 = vld [vmem:[#allocation2] sm:$0xff]  ;;  %v571_v1 = vld [vmem:[#allocation2 + $0x8] sm:$0xff]  ;;  %v486_v8 = vmov 0.0   ;;  %s487_s3 = smov [#allocation11]  }
  0x4a   :  { %v573_v2 = vld [vmem:[#allocation2 + $0x10] sm:$0xff]  ;;  %vm112_vm0 = vcmp.lt.f32.partialorder %v569_v0, 192.0  ;;  %vm116_vm1 = vcmp.ge.f32.partialorder %v569_v0, 0.0  ;;  %vm113_vm2 = vcmp.lt.f32.partialorder %v571_v1, 192.0  ;;  %vm117_vm3 = vcmp.ge.f32.partialorder %v571_v1, 0.0  ;;  %v579_v3 = vld [vmem:[#allocation2 + $0x18] sm:$0xff] }
  0x4b   :  { %v148_v4 = vld [vmem:[#allocation5] sm:$0xff]  ;;  %vm581_vm4 = vmand %vm112_vm0, %vm116_vm1  ;;  %vm114_vm5 = vcmp.lt.f32.partialorder %v573_v2, 192.0  ;;  %vm118_vm6 = vcmp.ge.f32.partialorder %v573_v2, 0.0  ;;  %vm115_vm7 = vcmp.lt.f32.partialorder %v579_v3, 192.0  ;;  %vm119_vm8 = vcmp.ge.f32.partialorder %v579_v3, 0.0  ;;  %v149_v6 = vld [vmem:[#allocation5 + $0x8] sm:$0xff] }
  0x4c   :  { %v150_v7 = vld [vmem:[#allocation5 + $0x10] sm:$0xff]  ;;  %v327_v9 = vsel %vm581_vm4, 1.0, %v486_v8  ;;  %vm591_vm9 = vmand %vm113_vm2, %vm117_vm3  ;;  %v152_v11 = vsub.f32 %v148_v4, %v569_v0  ;;  %v153_v12 = vsub.f32 %v149_v6, %v571_v1  ;;  %v151_v14 = vld [vmem:[#allocation5 + $0x18] sm:$0xff]  ;;  %s312_s13 = sshll.u32 %s487_s3, 4  ;;  %s313_s13 = int_to_ptr.vmem [resolvable:$true] %s312_s13 }
  0x4d   :  { %v154_v13 = vsub.f32 %v150_v7, %v573_v2  ;;  %v196_v15 = vld [vmem:[#allocation7] sm:$0xff]  ;;  %v328_v16 = vsel %vm591_vm9, 1.0, %v486_v8  ;;  %vm602_vm10 = vmand %vm114_vm5, %vm118_vm6  ;;  %v155_v18 = vsub.f32 %v151_v14, %v579_v3  ;;  %v197_v24 = vld [vmem:[#allocation7 + $0x8] sm:$0xff]  ;;  %144 = vst [vmem:[#allocation11] sm:$0xff] %v327_v9  ;;  %s428_s14 = scalar_lea.vmem %s313_s13, 512  ;;  %p433_p5 = scmp.lt.s32.totalorder %s313_s13, %s313_s13 }
  0x4e   :  { %v200_v19 = vsub.f32 %v196_v15, %v569_v0  ;;  %v329_v20 = vsel %vm602_vm10, 1.0, %v486_v8  ;;  %vm614_vm11 = vmand %vm115_vm7, %vm119_vm8  ;;  %v156_v22 = vsel %vm581_vm4, %v152_v11, 0.0  ;;  %v157_v23 = vsel %vm591_vm9, %v153_v12, 0.0  ;;  %v198_v25 = vld [vmem:[#allocation7 + $0x10] sm:$0xff]  ;;  %v199_v29 = vld [vmem:[#allocation7 + $0x18] sm:$0xff]  ;;  %145 = vst [vmem:[#allocation11 + $0x8] sm:$0xff] %v328_v16  ;;  %p429_p4 = scmp.ne.s32.totalorder %s313_s13, %s428_s14  ;;  %p434_p6 = scmp.lt.s32.totalorder %s428_s14, %s428_s14 }
  0x4f   :  { %v330_v26 = vsel %vm614_vm11, 1.0, %v486_v8  ;;  %v160_v27 = vand.u32 2147483647, %v156_v22  ;;  %v161_v28 = vand.u32 2147483647, %v157_v23  ;;  %v158_v30 = vsel %vm602_vm10, %v154_v13, 0.0 }
  0x50   :  { %v159_v31 = vsel %vm614_vm11, %v155_v18, 0.0  ;;  %v204_v32 = vsel %vm581_vm4, %v200_v19, 0.0  ;;  %146 = vst [vmem:[#allocation11 + $0x10] sm:$0xff] %v329_v20  ;;  %v162_v35 = vand.u32 2147483647, %v158_v30  ;;  %147 = vst [vmem:[#allocation11 + $0x18] sm:$0xff] %v330_v26  ;;  %v201_v38 = vsub.f32 %v197_v24, %v571_v1  ;;  %p435_p7 = por %p434_p6, %p433_p5 }
  0x51   :  { %v164_v33 = vmin.f32 %v160_v27, 1.0  ;;  %v165_v34 = vmin.f32 %v161_v28, 1.0  ;;  %v163_v36 = vand.u32 2147483647, %v159_v31  ;;  %v208_v37 = vand.u32 2147483647, %v204_v32 }
  0x52   :  { %v202_v39 = vsub.f32 %v198_v25, %v573_v2  ;;  %v203_v40 = vsub.f32 %v199_v29, %v579_v3  ;;  %v245_v41 = vld [vmem:[#allocation8] sm:$0xff]  ;;  %v166_v44 = vmin.f32 %v162_v35, 1.0  ;;  %p436_p8 = pnand %p435_p7, %p429_p4 }
  0x53   :  { %v168_v42 = vmul.f32 0.5, %v164_v33  ;;  %v169_v43 = vmul.f32 0.5, %v165_v34  ;;  %v167_v45 = vmin.f32 %v163_v36, 1.0 }
  0x54   :  { %439 = shalt.err (!%p436_p8)
}
  0x55   :  { %s440_s16 = scalar_lea.hbm %s680_s5, 512 }
  0x56   :  { %p441_p9 = scmp.ne.s32.totalorder %s680_s5, %s440_s16  ;;  %p444_p10 = scmp.lt.u32.totalorder %s440_s16, %s680_s5 }
  0x58   :  { %p446_p11 = pnand %p444_p10, %p441_p9 }
  0x5a   :  { %449 = shalt.err (!%p446_p11)
}
  0x5b   :  { %315 = dma.vmem_to_hbm [thread:$0]  %s313_s13, 512, %s680_s5, [#allocation12]   ;;  %v212_v46 = vmin.f32 %v208_v37, 1.0  ;;  %v205_v47 = vsel %vm591_vm9, %v201_v38, 0.0  ;;  %v206_v48 = vsel %vm602_vm10, %v202_v39, 0.0  ;;  %v207_v49 = vsel %vm614_vm11, %v203_v40, 0.0 }
  0x5c   :  { %v172_v50 = vsub.f32 %v160_v27, %v168_v42  ;;  %v173_v51 = vsub.f32 %v161_v28, %v169_v43  ;;  %v170_v52 = vmul.f32 0.5, %v166_v44  ;;  %v171_v53 = vmul.f32 0.5, %v167_v45  ;;  %v246_v7 = vld [vmem:[#allocation8 + $0x8] sm:$0xff]  ;;  %v247_v15 = vld [vmem:[#allocation8 + $0x10] sm:$0xff]  ;;  %v248_v16 = vld [vmem:[#allocation8 + $0x18] sm:$0xff]  ;;  %s488_s5 = smov [#allocation10]  }
  0x5d   :  { %v216_v54 = vmul.f32 0.5, %v212_v46  ;;  %v209_v55 = vand.u32 2147483647, %v205_v47  ;;  %v210_v56 = vand.u32 2147483647, %v206_v48  ;;  %v249_v57 = vsub.f32 %v245_v41, %v569_v0  ;;  %s299_s24 = sshll.u32 %s488_s5, 4  ;;  %s300_s24 = int_to_ptr.vmem [resolvable:$true] %s299_s24 }
  0x5e   :  { %v176_v58 = vmul.f32 %v172_v50, %v164_v33  ;;  %v177_v59 = vmul.f32 %v173_v51, %v165_v34  ;;  %v174_v60 = vsub.f32 %v162_v35, %v170_v52  ;;  %v175_v61 = vsub.f32 %v163_v36, %v171_v53  ;;  %s450_s25 = scalar_lea.vmem %s300_s24, 1536  ;;  %p455_p13 = scmp.lt.s32.totalorder %s300_s24, %s300_s24 }
  0x5f   :  { %v220_v62 = vsub.f32 %v208_v37, %v216_v54  ;;  %v213_v63 = vmin.f32 %v209_v55, 1.0  ;;  %v214_v4 = vmin.f32 %v210_v56, 1.0  ;;  %v211_v6 = vand.u32 2147483647, %v207_v49  ;;  %p451_p12 = scmp.ne.s32.totalorder %s300_s24, %s450_s25  ;;  %p456_p0 = scmp.lt.s32.totalorder %s450_s25, %s450_s25 }
  0x60   :  { %v178_v8 = vmul.f32 %v174_v60, %v166_v44  ;;  %v179_v9 = vmul.f32 %v175_v61, %v167_v45  ;;  %192 = vst [vmem:[#allocation10] sm:$0xff] %v176_v58  ;;  %193 = vst [vmem:[#allocation10 + $0x8] sm:$0xff] %v177_v59  ;;  %v253_v0 = vsel %vm581_vm4, %v249_v57, 0.0  ;;  %v250_v18 = vsub.f32 %v246_v7, %v571_v1 }
  0x61   :  { %v224_v11 = vmul.f32 %v220_v62, %v212_v46  ;;  %v217_v12 = vmul.f32 0.5, %v213_v63  ;;  %v218_v13 = vmul.f32 0.5, %v214_v4  ;;  %v215_v14 = vmin.f32 %v211_v6, 1.0  ;;  %p457_p1 = por %p456_p0, %p455_p13 }
  0x62   :  { %194 = vst [vmem:[#allocation10 + $0x10] sm:$0xff] %v178_v8  ;;  %195 = vst [vmem:[#allocation10 + $0x18] sm:$0xff] %v179_v9  ;;  %v257_v23 = vand.u32 2147483647, %v253_v0  ;;  %v254_v24 = vsel %vm591_vm9, %v250_v18, 0.0  ;;  %v251_v25 = vsub.f32 %v247_v15, %v573_v2  ;;  %v252_v26 = vsub.f32 %v248_v16, %v579_v3 }
  0x63   :  { %v221_v19 = vsub.f32 %v209_v55, %v217_v12  ;;  %v222_v20 = vsub.f32 %v210_v56, %v218_v13  ;;  %v219_v22 = vmul.f32 0.5, %v215_v14  ;;  %241 = vst [vmem:[#allocation10 + $0x20] sm:$0xff] %v224_v11  ;;  %v258_v29 = vand.u32 2147483647, %v254_v24  ;;  %p458_p2 = pnand %p457_p1, %p451_p12 }
  0x64   :  { %v261_v30 = vmin.f32 %v257_v23, 1.0  ;;  %v255_v1 = vsel %vm602_vm10, %v251_v25, 0.0  ;;  %v256_v31 = vsel %vm614_vm11, %v252_v26, 0.0 }
  0x65   :  { %v225_v27 = vmul.f32 %v221_v19, %v213_v63  ;;  %v226_v28 = vmul.f32 %v222_v20, %v214_v4  ;;  %v223_v5 = vsub.f32 %v211_v6, %v219_v22  ;;  %v262_v33 = vmin.f32 %v258_v29, 1.0 }
  0x66   :  { %v265_v10 = vmul.f32 0.5, %v261_v30  ;;  %v259_v34 = vand.u32 2147483647, %v255_v1  ;;  %v260_v35 = vand.u32 2147483647, %v256_v31 }
  0x67   :  { %v227_v32 = vmul.f32 %v223_v5, %v215_v14  ;;  %242 = vst [vmem:[#allocation10 + $0x28] sm:$0xff] %v225_v27  ;;  %243 = vst [vmem:[#allocation10 + $0x30] sm:$0xff] %v226_v28  ;;  %v266_v2 = vmul.f32 0.5, %v262_v33 }
  0x68   :  { %v269_v3 = vsub.f32 %v257_v23, %v265_v10  ;;  %v263_v36 = vmin.f32 %v259_v34, 1.0  ;;  %v264_v37 = vmin.f32 %v260_v35, 1.0 }
  0x69   :  { %244 = vst [vmem:[#allocation10 + $0x38] sm:$0xff] %v227_v32  ;;  %v270_v38 = vsub.f32 %v258_v29, %v266_v2 }
  0x6a   :  { %v273_v39 = vmul.f32 %v269_v3, %v261_v30  ;;  %v267_v40 = vmul.f32 0.5, %v263_v36  ;;  %v268_v17 = vmul.f32 0.5, %v264_v37 }
  0x6b   :  { %v274_v41 = vmul.f32 %v270_v38, %v262_v33 }
  0x6c   :  { %v271_v42 = vsub.f32 %v259_v34, %v267_v40  ;;  %v272_v21 = vsub.f32 %v260_v35, %v268_v17  ;;  %290 = vst [vmem:[#allocation10 + $0x40] sm:$0xff] %v273_v39 }
  0x6d   :  { %291 = vst [vmem:[#allocation10 + $0x48] sm:$0xff] %v274_v41 }
  0x6e   :  { %v275_v43 = vmul.f32 %v271_v42, %v263_v36  ;;  %v276_v44 = vmul.f32 %v272_v21, %v264_v37 }
  0x70   :  { %292 = vst [vmem:[#allocation10 + $0x50] sm:$0xff] %v275_v43  ;;  %293 = vst [vmem:[#allocation10 + $0x58] sm:$0xff] %v276_v44 }
  0x71   :  { %461 = shalt.err (!%p458_p2)
}
  0x72   :  { %s462_s0 = scalar_lea.hbm %s679_s4, 1536 }
  0x73   :  { %p463_p3 = scmp.ne.s32.totalorder %s679_s4, %s462_s0  ;;  %p466_p4 = scmp.lt.u32.totalorder %s462_s0, %s679_s4 }
  0x75   :  { %p468_p5 = pnand %p466_p4, %p463_p3 }
  0x77   :  { %471 = shalt.err (!%p468_p5)
}
  0x78   :  { %s489_s6 = smov 512   ;;  %s490_s7 = smov 32  }
  0x79   :  { %305 = dma.vmem_to_hbm [thread:$0]  %s300_s24, 1536, %s679_s4, [#allocation4], %s489_s6, %s489_s6, %s490_s7  }
  0x7a   :  { %478 = dma.done.wait [#allocation4], 1536  }
  0x7b   :  { %479 = vsyncadd [#allocation4], 4294965760 }
  0x7c   :  { %480 = dma.done.wait [#allocation12], 512  }
  0x7d   :  { %481 = vsyncadd [#allocation12], 4294966784 }
  0x7e   :  { %322 = vsyncpa [#allocation3], 1 }
  0x7f   :  { %323 = vsyncpa [#allocation6], 1 }
  0x80   :  { %324 = vsyncpa [#allocation9], 1 }
  0x81   :  { %325 = vsyncpa [#allocation4], 1 }
  0x82   :  { %326 = vsyncpa [#allocation12], 1 }

</bundles_post_ra>
